<compile_context>
chip_gen: v7x
topology: tpu7x:2x2x1
jax: 0.10.0
libtpu: 0.0.40
codegen_flags: <defaults>
</compile_context>

<pallas_src>
import jax
import jax.numpy as jnp
from jax.experimental import pallas as pl
from jax.experimental.pallas import tpu as pltpu


IN_FEATURES = 4
HIDDEN = 32

# Default rows per batch tile: large enough to amortize the ~0.35 us/step
# pipeline overhead, small enough that the double-buffered, lane-padded
# footprint stays well under v7x's 64 MiB VMEM.
DEFAULT_TB = 8192

# Below this batch size the Pallas launch + DMA setup dominates -> plain XLA.
PALLAS_MIN_BATCH = 512


def _round_up(n, m):
    return ((n + m - 1) // m) * m


def reference_forward(x, w1, b1, w2, b2):
    h = jnp.maximum(x @ w1 + b1, 0.0)
    return h @ w2 + b2


def value_net_kernel(x_ref, w1_ref, b1_ref, w2r_ref, b2_ref, o_ref):
    """One (TB, 4) batch tile -> (TB, 1) values."""
    # Hidden layer on the MXU: (TB, 4) @ (4, 32); bias + ReLU on the VPU.
    h = jnp.dot(x_ref[...], w1_ref[...], preferred_element_type=jnp.float32)
    h = jnp.maximum(h + b1_ref[...], 0.0)
    # Output column: elementwise multiply by the (1, 32) weight row and a lane
    # reduction -- avoids a full MXU pass for a single output column.
    out = jnp.sum(h * w2r_ref[...], axis=-1, keepdims=True)
    # b2 is a scalar living in SMEM.
    o_ref[...] = (out + b2_ref[0, 0]).astype(o_ref.dtype)


def value_net_forward_pallas(x, w1, b1, w2, b2, *, tb=DEFAULT_TB):
    """Pallas forward pass. x: (B, 4) f32 -> (B, 1) f32."""
    B, F = x.shape
    assert F == IN_FEATURES

    # Tile size: multiple of 8 (sublane), clamped to the (padded) batch.
    tb = max(8, min(_round_up(tb, 8), _round_up(B, 8)))
    b_pad = _round_up(B, tb)
    if b_pad != B:
        x = jnp.pad(x, ((0, b_pad - B), (0, 0)))

    w2_row = w2.reshape(1, HIDDEN)  # lane-major row of the output weights
    b2_s = b2.reshape(1, 1)         # scalar -> SMEM

    grid = (b_pad // tb,)

    # Lane-padded VMEM footprint: (TB, 4) and (TB, 1) f32 tiles each occupy
    # TB x 128 lanes x 4 B = 512 B/row; double-buffered input + output, plus a
    # (TB, 32)->(TB, 128) hidden temp and tiny resident weights + slack.
    row_bytes = 128 * 4
    vmem_limit = 2 * tb * row_bytes       # x tile, double-buffered
    vmem_limit += 2 * tb * row_bytes      # out tile, double-buffered
    vmem_limit += tb * row_bytes          # hidden activations
    vmem_limit += 1 << 20                 # weights/biases + slack
    vmem_limit = min(max(vmem_limit, 4 << 20), 48 << 20)

    out = pl.pallas_call(
        value_net_kernel,
        out_shape=jax.ShapeDtypeStruct((b_pad, 1), jnp.float32),
        grid=grid,
        in_specs=[
            pl.BlockSpec((tb, IN_FEATURES), lambda i: (i, 0)),       # x tile
            pl.BlockSpec((IN_FEATURES, HIDDEN), lambda i: (0, 0)),   # w1 (resident)
            pl.BlockSpec((1, HIDDEN), lambda i: (0, 0)),             # b1 (resident)
            pl.BlockSpec((1, HIDDEN), lambda i: (0, 0)),             # w2 row (resident)
            pl.BlockSpec(memory_space=pltpu.MemorySpace.SMEM),       # b2 scalar
        ],
        out_specs=pl.BlockSpec((tb, 1), lambda i: (i, 0)),
        compiler_params=pltpu.CompilerParams(
            dimension_semantics=("parallel",),  # shard batch tiles across TCs
            vmem_limit_bytes=vmem_limit,
        ),
    )(x, w1, b1, w2_row, b2_s)

    return out[:B]


def value_net_forward(x, w1, b1, w2, b2, *, tb=DEFAULT_TB):
    """Dispatcher: tiny batches use plain XLA (Pallas is pure launch overhead
    there); large batches use the pipelined Pallas kernel."""
    if x.shape[0] < PALLAS_MIN_BATCH:
        return reference_forward(x, w1, b1, w2, b2)
    return value_net_forward_pallas(x, w1, b1, w2, b2, tb=tb)


def init_params(key):
    """Deterministic init mimicking PyTorch's default Linear init
    (uniform(-1/sqrt(fan_in), 1/sqrt(fan_in))). Weights stored (in, out)."""
    k1, k2, k3, k4 = jax.random.split(key, 4)
    bound1 = 1.0 / jnp.sqrt(4.0)
    bound2 = 1.0 / jnp.sqrt(32.0)
    w1 = jax.random.uniform(k1, (IN_FEATURES, HIDDEN), jnp.float32, -bound1, bound1)
    b1 = jax.random.uniform(k2, (1, HIDDEN), jnp.float32, -bound1, bound1)
    w2 = jax.random.uniform(k3, (HIDDEN, 1), jnp.float32, -bound2, bound2)
    b2 = jax.random.uniform(k4, (1, 1), jnp.float32, -bound2, bound2)
    return w1, b1, w2, b2


if __name__ == "__main__":
    key = jax.random.PRNGKey(0)
    k_params, k_x1, k_x2 = jax.random.split(key, 3)

    w1, b1, w2, b2 = init_params(k_params)

    # Small CartPole-like batch: 8 states of 4 features (single-tile grid).
    x_small = jax.random.normal(k_x1, (8, IN_FEATURES), jnp.float32)
    out_small = jax.block_until_ready(
        value_net_forward_pallas(x_small, w1, b1, w2, b2)
    )
    ref_small = reference_forward(x_small, w1, b1, w2, b2)
    assert out_small.shape == (8, 1)
    assert jnp.allclose(out_small, ref_small, atol=1e-5, rtol=1e-5), "small mismatch"

    # Larger (still modest) batch exercising the multi-tile pipelined grid:
    # 1000 rows, TB=256 -> padded to 1024, grid=(4,), ragged remainder tested.
    x_big = jax.random.normal(k_x2, (1000, IN_FEATURES), jnp.float32)
    out_big = jax.block_until_ready(
        value_net_forward_pallas(x_big, w1, b1, w2, b2, tb=256)
    )
    ref_big = reference_forward(x_big, w1, b1, w2, b2)
    assert out_big.shape == (1000, 1)
    assert jnp.allclose(out_big, ref_big, atol=1e-5, rtol=1e-5), "big mismatch"

    print("KERNEL_OK")
</pallas_src>

<mosaic_0001>
module attributes {stable_mosaic.version = 11 : i64} {
  func.func @value_net_kernel(%arg0: i32, %arg1: memref<8x4xf32, #tpu.memory_space<vmem>>, %arg2: memref<4x32xf32, #tpu.memory_space<vmem>>, %arg3: memref<1x32xf32, #tpu.memory_space<vmem>>, %arg4: memref<1x32xf32, #tpu.memory_space<vmem>>, %arg5: memref<1x1xf32, #tpu.memory_space<smem>>, %arg6: memref<8x1xf32, #tpu.memory_space<vmem>>) attributes {dimension_semantics = [#tpu.dimension_semantics<parallel>], iteration_bounds = array<i64: 1>, scalar_prefetch = 0 : i64, scratch_operands = 0 : i64, tpu.core_type = #tpu.core_type<tc>, window_params = [{transform_indices = @transform_0, window_bounds = array<i64: 8, 4>}, {pipeline_mode = #tpu.pipeline_mode<synchronous>, transform_indices = @transform_1, window_bounds = array<i64: 4, 32>}, {pipeline_mode = #tpu.pipeline_mode<synchronous>, transform_indices = @transform_2, window_bounds = array<i64: 1, 32>}, {pipeline_mode = #tpu.pipeline_mode<synchronous>, transform_indices = @transform_3, window_bounds = array<i64: 1, 32>}, {transform_indices = @transform_4, window_bounds = array<i64: 1, 1>}, {transform_indices = @transform_5, window_bounds = array<i64: 8, 1>}]} {
    %c0 = arith.constant 0 : index
    %c0_0 = arith.constant 0 : index
    %0 = vector.load %arg1[%c0, %c0_0] : memref<8x4xf32, #tpu.memory_space<vmem>>, vector<8x4xf32>
    %c0_1 = arith.constant 0 : index
    %c0_2 = arith.constant 0 : index
    %1 = vector.load %arg2[%c0_1, %c0_2] : memref<4x32xf32, #tpu.memory_space<vmem>>, vector<4x32xf32>
    %cst = arith.constant dense<0.000000e+00> : vector<8x32xf32>
    %2 = tpu.matmul %0, %1, %cst {dimension_numbers = #tpu.dot_dimension_numbers<[1], [0], [0], [1], [0, 0, 1, 1], [], []>} : vector<8x4xf32>, vector<4x32xf32>, vector<8x32xf32> -> vector<8x32xf32>
    %c0_3 = arith.constant 0 : index
    %c0_4 = arith.constant 0 : index
    %3 = vector.load %arg3[%c0_3, %c0_4] : memref<1x32xf32, #tpu.memory_space<vmem>>, vector<1x32xf32>
    %4 = vector.broadcast %3 : vector<1x32xf32> to vector<8x32xf32>
    %5 = arith.addf %2, %4 : vector<8x32xf32>
    %cst_5 = arith.constant 0.000000e+00 : f32
    %6 = vector.broadcast %cst_5 : f32 to vector<8x32xf32>
    %7 = arith.maximumf %5, %6 : vector<8x32xf32>
    %c0_6 = arith.constant 0 : index
    %c0_7 = arith.constant 0 : index
    %8 = vector.load %arg4[%c0_6, %c0_7] : memref<1x32xf32, #tpu.memory_space<vmem>>, vector<1x32xf32>
    %9 = vector.broadcast %8 : vector<1x32xf32> to vector<8x32xf32>
    %10 = arith.mulf %7, %9 : vector<8x32xf32>
    %cst_8 = arith.constant dense<0.000000e+00> : vector<8xf32>
    %11 = vector.multi_reduction <add>, %10, %cst_8 [1] : vector<8x32xf32> to vector<8xf32>
    %12 = vector.shape_cast %11 : vector<8xf32> to vector<8x1xf32>
    %c0_9 = arith.constant 0 : index
    %c0_10 = arith.constant 0 : index
    %13 = memref.load %arg5[%c0_9, %c0_10] : memref<1x1xf32, #tpu.memory_space<smem>>
    %14 = vector.broadcast %13 : f32 to vector<8x1xf32>
    %15 = arith.addf %12, %14 : vector<8x1xf32>
    %c0_11 = arith.constant 0 : index
    %c0_12 = arith.constant 0 : index
    %16 = vector.load %arg6[%c0_11, %c0_12] : memref<8x1xf32, #tpu.memory_space<vmem>>, vector<8x1xf32>
    tpu.vector_store %arg6[%c0_11, %c0_12], %15 {strides = array<i32>} : memref<8x1xf32, #tpu.memory_space<vmem>>, vector<8x1xf32>,
    return
  }
  func.func @transform_0(%arg0: i32) -> (i32, i32) {
    %c0_i32 = arith.constant 0 : i32
    %c0_i32_0 = arith.constant 0 : i32
    return %arg0, %c0_i32 : i32, i32
  }
  func.func @transform_1(%arg0: i32) -> (i32, i32) {
    %c0_i32 = arith.constant 0 : i32
    %c0_i32_0 = arith.constant 0 : i32
    %c0_i32_1 = arith.constant 0 : i32
    return %c0_i32, %c0_i32_0 : i32, i32
  }
  func.func @transform_2(%arg0: i32) -> (i32, i32) {
    %c0_i32 = arith.constant 0 : i32
    %c0_i32_0 = arith.constant 0 : i32
    %c0_i32_1 = arith.constant 0 : i32
    return %c0_i32, %c0_i32_0 : i32, i32
  }
  func.func @transform_3(%arg0: i32) -> (i32, i32) {
    %c0_i32 = arith.constant 0 : i32
    %c0_i32_0 = arith.constant 0 : i32
    %c0_i32_1 = arith.constant 0 : i32
    return %c0_i32, %c0_i32_0 : i32, i32
  }
  func.func @transform_4(%arg0: i32) -> (i32, i32) {
    %c0_i32 = arith.constant 0 : i32
    %c0_i32_0 = arith.constant 0 : i32
    %c0_i32_1 = arith.constant 0 : i32
    return %c0_i32, %c0_i32_0 : i32, i32
  }
  func.func @transform_5(%arg0: i32) -> (i32, i32) {
    %c0_i32 = arith.constant 0 : i32
    %c0_i32_0 = arith.constant 0 : i32
    return %arg0, %c0_i32 : i32, i32
  }
}

</mosaic_0001>

<bundles_post_ra>
// kernel: tpu_custom_call.1
= control target key start
LH: loop header
LB: loop body
LE: loop exit
PB: predicated region body
PF: predicated region fallthrough
CT: control target
= control target key end

     0   :  { %vm34_vm0 = vcmask 1043456   ;;  %vm30_vm1 = vcmask 31744   ;;  %v143_v0 = vmov 0.0   ;;  %vm144_vm2 = vmmov 0   ;;  %s193_s1 = inlined_call_operand.vmem [shape: f32[4,32], index: 1, kind: input, shape index: {}]   ;;  %s194_s0 = inlined_call_operand.vmem [shape: f32[8,4], index: 0, kind: input, shape index: {}]   ;;  %s195_s2 = inlined_call_operand.vmem [shape: f32[1,32], index: 2, kind: input, shape index: {}]   ;;  %s196_s3 = inlined_call_operand.vmem [shape: f32[1,32], index: 3, kind: input, shape index: {}]   ;;  %s197_s4 = inlined_call_operand.<no memory space> [shape: f32[1,1], index: 4, kind: input, shape index: {}]   ;;  %s198_s5 = inlined_call_operand.vmem [shape: f32[8,1], index: 5, kind: output, shape index: {}]  }
   0x1   :  { %136 = vmatprep.subr.mxu0 %v143_v0  ;;  %v22_v1 = vld [vmem:[%s193_s1] sm:$0xf]  ;;  %138 = vmatprep.mubr.msk.f32.mxu0 %vm144_vm2, %v143_v0  ;;  %vm117_vm3 = vcmask 261120   ;;  %v122_v11 = vstv %s197_s4  ;;  %vm124_vm4 = vcmask 7168  }
   0x2   :  { %v21_v2 = vld [vmem:[%s194_s0] sm:$0xff]  ;;  %137 = vmatpush3.msk.msra.mxu0 %vm34_vm0, %v22_v1 }
   0x3   :  { %139 = vmatmul.mubr.msk.f32.vlgmr.msra.gmra.mrb[0].mxu0 %vm30_vm1, %v21_v2  ;;  %v130_v3 = vld [vmem:[%s195_s2] ss:$0 sm:$0xff] }
   0x4   :  { %v133_v7 = vld [vmem:[%s196_s3] ss:$0 sm:$0xff] }
  0xd6   :  { %v104_v4 = vpop.f32.mrb[0].mxu0 }
  0xd7   :  { %v105_v5 = vadd.f32 %v130_v3, %v104_v4  ;;  %v140_v6 = vpop.f32.mrb[1].mxu0 }
  0xd9   :  { %v108_v8 = vmax.f32 %v105_v5, 0.0 }
  0xdb   :  { %v116_v9 = vmul.f32 %v133_v7, %v108_v8 }
  0xdd   :  { %v118_v10 = vsel %vm117_vm3, %v116_v9, 0.0 }
  0xde   :  { %119 = vadd.xlane.f32.xlu0 %v118_v10 }
 0x16b   :  { %v120_v12 = vpop.xlane.xlu0 %119 }
 0x16c   :  { %v123_v13 = vadd.f32 %v122_v11, %v120_v12 }
 0x16e   :  { %125 = vst.msk [vmem:[%s198_s5] sm:$0xff] %vm124_vm4, %v123_v13 }

</bundles_post_ra>
